<compile_context>
chip_gen: v7x
topology: tpu7x:2x2x1
jax: 0.10.0
libtpu: 0.0.40
codegen_flags: <defaults>
</compile_context>

<pallas_src>
import math
from functools import partial

import numpy as np
import jax
import jax.numpy as jnp
from jax.experimental import pallas as pl
from jax.experimental.pallas import tpu as pltpu

FREQ_NUM = 16
MAX_RADIUS = 350.0
MIN_RADIUS = 1.0
ENC_DIM = 6 * FREQ_NUM  # 96
LN_EPS = 1e-5           # torch.nn.LayerNorm default


def _round_up(v, m):
    return ((v + m - 1) // m) * m


# ----------------------------------------------------------------------------
# Encoder constants: TheoryGridCellSpatialRelationEncoder is equivalent to
#   pre[:, f*6 + d] = (coords . unit_vec[d//2]) * freq[f]
#   emb = sin(pre + phase),  phase = 0 (even col, sin) or pi/2 (odd col, cos)
# ----------------------------------------------------------------------------
def _encoder_consts():
    inc = math.log(MAX_RADIUS / MIN_RADIUS) / (FREQ_NUM - 1)
    freqs = 1.0 / (MIN_RADIUS * np.exp(np.arange(FREQ_NUM, dtype=np.float64) * inc))
    uv = np.array([[1.0, 0.0],
                   [-0.5, math.sqrt(3.0) / 2.0],
                   [-0.5, -math.sqrt(3.0) / 2.0]], dtype=np.float64)
    A = np.zeros((2, ENC_DIM), dtype=np.float32)
    phase = np.zeros((1, ENC_DIM), dtype=np.float32)
    for f in range(FREQ_NUM):
        for d in range(6):
            A[:, f * 6 + d] = (uv[d // 2] * freqs[f]).astype(np.float32)
            phase[0, f * 6 + d] = 0.0 if d % 2 == 0 else math.pi / 2.0
    return jnp.asarray(A), jnp.asarray(phase)


# ----------------------------------------------------------------------------
# Pallas kernel: one token tile per grid step, all weights resident in VMEM.
# ----------------------------------------------------------------------------
def _context_kernel(ctx_ref, A_ref, phase_ref,
                    w1x_ref, w1e_ref, b1_ref, g1_ref, be1_ref,
                    w2_ref, b2_ref, g2_ref, be2_ref,
                    w3x_ref, w3p_ref, b3_ref, g3_ref, be3_ref,
                    w4_ref, b4_ref, g4_ref, be4_ref,
                    out_ref):
    H = out_ref.shape[1]
    P = w3p_ref.shape[0]

    ctx = ctx_ref[...]                                   # (tm, 2+P+H) f32
    dx = ctx[:, 0:1]                                     # (tm, 1) lane 0
    dy = ctx[:, 1:2]                                     # (tm, 1) lane 1
    poi = ctx[:, 2:2 + P]                                # (tm, P)
    x = ctx[:, 2 + P:2 + P + H]                          # (tm, H)

    # --- TheoryGridCellSpatialRelationEncoder: VPU rank-1 FMAs + ONE EUP sin
    #     (cos(x) = sin(x + pi/2) folded into a phase constant).
    pre = dx * A_ref[0:1, :] + dy * A_ref[1:2, :]        # (tm, 96) f32
    emb = jnp.sin(pre + phase_ref[...])

    def layernorm(v, g_ref, b_ref):
        # De-serialized stats: E[v] and E[v^2] reduce independently (XLU
        # pipelining), var = E[v^2] - mu^2 (clamped for numerical safety).
        mu = jnp.mean(v, axis=-1, keepdims=True)
        msq = jnp.mean(v * v, axis=-1, keepdims=True)
        var = jnp.maximum(msq - mu * mu, 0.0)
        return (v - mu) * jax.lax.rsqrt(var + LN_EPS) * g_ref[...] + b_ref[...]

    def mm(a, w_ref):                                    # MXU, f32 accumulate
        return jnp.dot(a.astype(w_ref.dtype), w_ref[...],
                       preferred_element_type=jnp.float32)

    # --- comb_xy: split-accumulate GEMM (no lane concat) -> LN -> ReLU ->
    #     GEMM -> LN -> Dropout(identity)
    h = mm(x, w1x_ref) + mm(emb, w1e_ref) + b1_ref[...]
    h = layernorm(h, g1_ref, be1_ref)
    h = jnp.maximum(h, 0.0)
    h = mm(h, w2_ref) + b2_ref[...]
    h = layernorm(h, g2_ref, be2_ref)
    x = x + h                                            # Dropout(0.1) = identity

    # --- comb_poi with poi_up_proj folded into W3p' (split-accumulate GEMM) --
    h = mm(x, w3x_ref) + mm(poi, w3p_ref) + b3_ref[...]
    h = layernorm(h, g3_ref, be3_ref)
    h = jnp.maximum(h, 0.0)
    h = mm(h, w4_ref) + b4_ref[...]
    h = layernorm(h, g4_ref, be4_ref)
    out_ref[...] = x + h


# ----------------------------------------------------------------------------
# Wrapper (jitted; tm / matmul_dtype static)
# ----------------------------------------------------------------------------
@partial(jax.jit, static_argnames=("tm", "matmul_dtype"))
def context_model_forward(x, xy, poi, params, *, tm=1024, matmul_dtype=jnp.bfloat16):
    B, N, H = x.shape
    P = poi.shape[-1]
    M = B * N
    A, phase = _encoder_consts()

    # Big token tiles (default 1024; sweep up to 2048 on large M) to amortize
    # the ~0.35us per-step pipeline overhead, but keep >=2 grid steps and an
    # EVEN step count so v7x's two TensorCores both get equal work under
    # dimension_semantics="parallel".  tm_eff stays a multiple of 8.
    tm_eff = int(min(tm, max(8, _round_up(-(-M // 2), 8))))
    steps = max(2, _round_up(-(-M // tm_eff), 2))
    M_pad = steps * tm_eff

    # One packed input slab per token: [dx, dy, poi..., x...]  (single DMA).
    packed = jnp.concatenate(
        [xy.reshape(M, 2).astype(jnp.float32),
         poi.reshape(M, P).astype(jnp.float32),
         x.reshape(M, H).astype(jnp.float32)], axis=-1)           # (M, 2+P+H)
    if M_pad != M:
        packed = jnp.pad(packed, ((0, M_pad - M), (0, 0)))

    # Fold poi_up_proj into comb_poi's first Linear (exact algebra, f32, once):
    #   concat(x, poi@Wp + bp) @ W3  ==  x @ W3x + poi @ (Wp@W3p) + (b3 + bp@W3p)
    w3x, w3p = params['w3'][:H], params['w3'][H:]
    w3p_fold = params['wp'] @ w3p                                 # (P, H)
    b3c = params['b3'] + params['bp'] @ w3p                       # (1, H)

    cast = lambda w: w.astype(matmul_dtype)                       # MXU operands
    weights = [cast(params['w1'][:H]), cast(params['w1'][H:]),
               params['b1'], params['g1'], params['be1'],
               cast(params['w2']), params['b2'], params['g2'], params['be2'],
               cast(w3x), cast(w3p_fold), b3c, params['g3'], params['be3'],
               cast(params['w4']), params['b4'], params['g4'], params['be4']]

    tok = lambda d: pl.BlockSpec((tm_eff, d), lambda i: (i, 0))   # token-tiled
    resident = pl.BlockSpec(memory_space=pltpu.MemorySpace.VMEM)  # single-buffered

    out = pl.pallas_call(
        _context_kernel,
        out_shape=jax.ShapeDtypeStruct((M_pad, H), jnp.float32),
        grid=(steps,),
        in_specs=[tok(2 + P + H), resident, resident] + [resident] * len(weights),
        out_specs=tok(H),
        compiler_params=pltpu.CompilerParams(
            dimension_semantics=("parallel",),
            vmem_limit_bytes=48 * 1024 * 1024),
    )(packed, A, phase, *weights)
    return out[:M].reshape(B, N, H)


# ----------------------------------------------------------------------------
# Deterministic parameter init (same shapes as the PyTorch module's __init__).
# ----------------------------------------------------------------------------
def init_params(key, hidden, input_dims, poi_dim):
    ks = jax.random.split(key, 5)

    def lin(k, fin, fout):
        kw, kb = jax.random.split(k)
        bound = 1.0 / math.sqrt(fin)
        w = jax.random.uniform(kw, (fin, fout), jnp.float32, -bound, bound)
        b = jax.random.uniform(kb, (1, fout), jnp.float32, -bound, bound)
        return w, b

    ones = lambda: jnp.ones((1, hidden), jnp.float32)
    zeros = lambda: jnp.zeros((1, hidden), jnp.float32)
    p = {}
    p['w1'], p['b1'] = lin(ks[0], hidden + ENC_DIM, hidden)
    p['g1'], p['be1'] = ones(), zeros()
    p['w2'], p['b2'] = lin(ks[1], hidden, hidden)
    p['g2'], p['be2'] = ones(), zeros()
    p['wp'], p['bp'] = lin(ks[2], poi_dim, input_dims)
    p['w3'], p['b3'] = lin(ks[3], hidden + input_dims, hidden)
    p['g3'], p['be3'] = ones(), zeros()
    p['w4'], p['b4'] = lin(ks[4], hidden, hidden)
    p['g4'], p['be4'] = ones(), zeros()
    return p


# ----------------------------------------------------------------------------
# Pure-JAX reference replicating the torch ops directly (for validation).
# ----------------------------------------------------------------------------
def _ref_encoder(xy):
    inc = math.log(MAX_RADIUS / MIN_RADIUS) / (FREQ_NUM - 1)
    timescales = MIN_RADIUS * np.exp(np.arange(FREQ_NUM, dtype=np.float64) * inc)
    freq_mat = jnp.asarray(np.repeat((1.0 / timescales)[:, None], 6, axis=1),
                           dtype=jnp.float32)                     # (16, 6)
    uv1 = jnp.array([1.0, 0.0], jnp.float32)
    uv2 = jnp.array([-0.5, math.sqrt(3.0) / 2.0], jnp.float32)
    uv3 = jnp.array([-0.5, -math.sqrt(3.0) / 2.0], jnp.float32)
    a1 = (xy @ uv1)[..., None]
    a2 = (xy @ uv2)[..., None]
    a3 = (xy @ uv3)[..., None]
    ang = jnp.concatenate([a1, a1, a2, a2, a3, a3], axis=-1)      # (B,N,6)
    ang = jnp.repeat(ang[..., None, :], FREQ_NUM, axis=-2) * freq_mat
    spr = ang.reshape(xy.shape[0], xy.shape[1], -1)               # (B,N,96)
    even = jnp.sin(spr[..., 0::2])
    odd = jnp.cos(spr[..., 1::2])
    return jnp.stack([even, odd], axis=-1).reshape(spr.shape)


def ref_forward(x, xy, poi, p):
    def ln(v, g, b):
        mu = v.mean(-1, keepdims=True)
        var = ((v - mu) ** 2).mean(-1, keepdims=True)
        return (v - mu) / jnp.sqrt(var + LN_EPS) * g[0] + b[0]

    emb = _ref_encoder(xy)
    res = jnp.concatenate([x, emb], axis=-1)
    h = ln(res @ p['w1'] + p['b1'][0], p['g1'], p['be1'])
    h = jax.nn.relu(h)
    h = ln(h @ p['w2'] + p['b2'][0], p['g2'], p['be2'])
    x = x + h

    poi_proj = poi @ p['wp'] + p['bp'][0]
    res = jnp.concatenate([x, poi_proj], axis=-1)
    h = ln(res @ p['w3'] + p['b3'][0], p['g3'], p['be3'])
    h = jax.nn.relu(h)
    h = ln(h @ p['w4'] + p['b4'][0], p['g4'], p['be4'])
    return x + h


if __name__ == "__main__":
    key = jax.random.PRNGKey(0)
    kx, kxy, kpoi, kp = jax.random.split(key, 4)

    B, N = 2, 8
    hidden_dims, input_dims, poi_dim = 32, 32, 16

    x = jax.random.normal(kx, (B, N, hidden_dims), jnp.float32)
    xy = jax.random.normal(kxy, (B, N, 2), jnp.float32) * 5.0     # (deltaX, deltaY)
    poi = jax.random.normal(kpoi, (B, N, poi_dim), jnp.float32)
    params = init_params(kp, hidden_dims, input_dims, poi_dim)

    ref = ref_forward(x, xy, poi, params)

    # Exact-semantics check: f32 MXU operands, tight tolerance.
    out_f32 = context_model_forward(x, xy, poi, params, matmul_dtype=jnp.float32)
    jax.block_until_ready(out_f32)
    np.testing.assert_allclose(np.asarray(out_f32), np.asarray(ref),
                               atol=2e-3, rtol=2e-3)

    # Performance path: bf16 MXU operands / f32 accumulate (default).
    out = context_model_forward(x, xy, poi, params)
    jax.block_until_ready(out)
    assert out.shape == (B, N, hidden_dims)
    np.testing.assert_allclose(np.asarray(out), np.asarray(ref),
                               atol=8e-2, rtol=8e-2)
    print("KERNEL_OK")
</pallas_src>

<mosaic_0001>
module attributes {stable_mosaic.version = 11 : i64} {
  func.func @_context_kernel(%arg0: i32, %arg1: memref<8x50xf32, #tpu.memory_space<vmem>>, %arg2: memref<2x96xf32, #tpu.memory_space<vmem>>, %arg3: memref<1x96xf32, #tpu.memory_space<vmem>>, %arg4: memref<32x32xf32, #tpu.memory_space<vmem>>, %arg5: memref<96x32xf32, #tpu.memory_space<vmem>>, %arg6: memref<1x32xf32, #tpu.memory_space<vmem>>, %arg7: memref<1x32xf32, #tpu.memory_space<vmem>>, %arg8: memref<1x32xf32, #tpu.memory_space<vmem>>, %arg9: memref<32x32xf32, #tpu.memory_space<vmem>>, %arg10: memref<1x32xf32, #tpu.memory_space<vmem>>, %arg11: memref<1x32xf32, #tpu.memory_space<vmem>>, %arg12: memref<1x32xf32, #tpu.memory_space<vmem>>, %arg13: memref<32x32xf32, #tpu.memory_space<vmem>>, %arg14: memref<16x32xf32, #tpu.memory_space<vmem>>, %arg15: memref<1x32xf32, #tpu.memory_space<vmem>>, %arg16: memref<1x32xf32, #tpu.memory_space<vmem>>, %arg17: memref<1x32xf32, #tpu.memory_space<vmem>>, %arg18: memref<32x32xf32, #tpu.memory_space<vmem>>, %arg19: memref<1x32xf32, #tpu.memory_space<vmem>>, %arg20: memref<1x32xf32, #tpu.memory_space<vmem>>, %arg21: memref<1x32xf32, #tpu.memory_space<vmem>>, %arg22: memref<8x32xf32, #tpu.memory_space<vmem>>) attributes {dimension_semantics = [#tpu.dimension_semantics<parallel>], iteration_bounds = array<i64: 2>, scalar_prefetch = 0 : i64, scratch_operands = 0 : i64, tpu.core_type = #tpu.core_type<tc>, window_params = [{transform_indices = @transform_0, window_bounds = array<i64: 8, 50>}, {pipeline_mode = #tpu.pipeline_mode<synchronous>, transform_indices = @transform_1, window_bounds = array<i64: 2, 96>}, {pipeline_mode = #tpu.pipeline_mode<synchronous>, transform_indices = @transform_2, window_bounds = array<i64: 1, 96>}, {pipeline_mode = #tpu.pipeline_mode<synchronous>, transform_indices = @transform_3, window_bounds = array<i64: 32, 32>}, {pipeline_mode = #tpu.pipeline_mode<synchronous>, transform_indices = @transform_4, window_bounds = array<i64: 96, 32>}, {pipeline_mode = #tpu.pipeline_mode<synchronous>, transform_indices = @transform_5, window_bounds = array<i64: 1, 32>}, {pipeline_mode = #tpu.pipeline_mode<synchronous>, transform_indices = @transform_6, window_bounds = array<i64: 1, 32>}, {pipeline_mode = #tpu.pipeline_mode<synchronous>, transform_indices = @transform_7, window_bounds = array<i64: 1, 32>}, {pipeline_mode = #tpu.pipeline_mode<synchronous>, transform_indices = @transform_8, window_bounds = array<i64: 32, 32>}, {pipeline_mode = #tpu.pipeline_mode<synchronous>, transform_indices = @transform_9, window_bounds = array<i64: 1, 32>}, {pipeline_mode = #tpu.pipeline_mode<synchronous>, transform_indices = @transform_10, window_bounds = array<i64: 1, 32>}, {pipeline_mode = #tpu.pipeline_mode<synchronous>, transform_indices = @transform_11, window_bounds = array<i64: 1, 32>}, {pipeline_mode = #tpu.pipeline_mode<synchronous>, transform_indices = @transform_12, window_bounds = array<i64: 32, 32>}, {pipeline_mode = #tpu.pipeline_mode<synchronous>, transform_indices = @transform_13, window_bounds = array<i64: 16, 32>}, {pipeline_mode = #tpu.pipeline_mode<synchronous>, transform_indices = @transform_14, window_bounds = array<i64: 1, 32>}, {pipeline_mode = #tpu.pipeline_mode<synchronous>, transform_indices = @transform_15, window_bounds = array<i64: 1, 32>}, {pipeline_mode = #tpu.pipeline_mode<synchronous>, transform_indices = @transform_16, window_bounds = array<i64: 1, 32>}, {pipeline_mode = #tpu.pipeline_mode<synchronous>, transform_indices = @transform_17, window_bounds = array<i64: 32, 32>}, {pipeline_mode = #tpu.pipeline_mode<synchronous>, transform_indices = @transform_18, window_bounds = array<i64: 1, 32>}, {pipeline_mode = #tpu.pipeline_mode<synchronous>, transform_indices = @transform_19, window_bounds = array<i64: 1, 32>}, {pipeline_mode = #tpu.pipeline_mode<synchronous>, transform_indices = @transform_20, window_bounds = array<i64: 1, 32>}, {transform_indices = @transform_21, window_bounds = array<i64: 8, 32>}]} {
    %c0 = arith.constant 0 : index
    %c0_0 = arith.constant 0 : index
    %0 = vector.load %arg1[%c0, %c0_0] : memref<8x50xf32, #tpu.memory_space<vmem>>, vector<8x50xf32>
    %1 = vector.extract_strided_slice %0 {offsets = [0, 0], sizes = [8, 1], strides = [1, 1]} : vector<8x50xf32> to vector<8x1xf32>
    %2 = vector.extract_strided_slice %0 {offsets = [0, 1], sizes = [8, 1], strides = [1, 1]} : vector<8x50xf32> to vector<8x1xf32>
    %3 = vector.extract_strided_slice %0 {offsets = [0, 2], sizes = [8, 16], strides = [1, 1]} : vector<8x50xf32> to vector<8x16xf32>
    %4 = vector.extract_strided_slice %0 {offsets = [0, 18], sizes = [8, 32], strides = [1, 1]} : vector<8x50xf32> to vector<8x32xf32>
    %c0_1 = arith.constant 0 : index
    %c0_2 = arith.constant 0 : index
    %5 = vector.load %arg2[%c0_1, %c0_2] : memref<2x96xf32, #tpu.memory_space<vmem>>, vector<1x96xf32>
    %6 = vector.broadcast %1 : vector<8x1xf32> to vector<8x96xf32>
    %7 = vector.broadcast %5 : vector<1x96xf32> to vector<8x96xf32>
    %8 = arith.mulf %6, %7 : vector<8x96xf32>
    %c1 = arith.constant 1 : index
    %c0_3 = arith.constant 0 : index
    %9 = vector.load %arg2[%c1, %c0_3] : memref<2x96xf32, #tpu.memory_space<vmem>>, vector<1x96xf32>
    %10 = vector.broadcast %2 : vector<8x1xf32> to vector<8x96xf32>
    %11 = vector.broadcast %9 : vector<1x96xf32> to vector<8x96xf32>
    %12 = arith.mulf %10, %11 : vector<8x96xf32>
    %13 = arith.addf %8, %12 : vector<8x96xf32>
    %c0_4 = arith.constant 0 : index
    %c0_5 = arith.constant 0 : index
    %14 = vector.load %arg3[%c0_4, %c0_5] : memref<1x96xf32, #tpu.memory_space<vmem>>, vector<1x96xf32>
    %15 = vector.broadcast %14 : vector<1x96xf32> to vector<8x96xf32>
    %16 = arith.addf %13, %15 : vector<8x96xf32>
    %17 = math.sin %16 : vector<8x96xf32>
    %c0_6 = arith.constant 0 : index
    %c0_7 = arith.constant 0 : index
    %18 = vector.load %arg4[%c0_6, %c0_7] : memref<32x32xf32, #tpu.memory_space<vmem>>, vector<32x32xf32>
    %cst = arith.constant dense<0.000000e+00> : vector<8x32xf32>
    %19 = tpu.matmul %4, %18, %cst {dimension_numbers = #tpu.dot_dimension_numbers<[1], [0], [0], [1], [0, 0, 1, 1], [], []>} : vector<8x32xf32>, vector<32x32xf32>, vector<8x32xf32> -> vector<8x32xf32>
    %c0_8 = arith.constant 0 : index
    %c0_9 = arith.constant 0 : index
    %20 = vector.load %arg5[%c0_8, %c0_9] : memref<96x32xf32, #tpu.memory_space<vmem>>, vector<96x32xf32>
    %cst_10 = arith.constant dense<0.000000e+00> : vector<8x32xf32>
    %21 = tpu.matmul %17, %20, %cst_10 {dimension_numbers = #tpu.dot_dimension_numbers<[1], [0], [0], [1], [0, 0, 1, 1], [], []>} : vector<8x96xf32>, vector<96x32xf32>, vector<8x32xf32> -> vector<8x32xf32>
    %22 = arith.addf %19, %21 : vector<8x32xf32>
    %c0_11 = arith.constant 0 : index
    %c0_12 = arith.constant 0 : index
    %23 = vector.load %arg6[%c0_11, %c0_12] : memref<1x32xf32, #tpu.memory_space<vmem>>, vector<1x32xf32>
    %24 = vector.broadcast %23 : vector<1x32xf32> to vector<8x32xf32>
    %25 = arith.addf %22, %24 : vector<8x32xf32>
    %cst_13 = arith.constant dense<0.000000e+00> : vector<8xf32>
    %26 = vector.multi_reduction <add>, %25, %cst_13 [1] : vector<8x32xf32> to vector<8xf32>
    %27 = vector.shape_cast %26 : vector<8xf32> to vector<8x1xf32>
    %cst_14 = arith.constant 3.200000e+01 : f32
    %28 = vector.broadcast %cst_14 : f32 to vector<8x1xf32>
    %29 = arith.divf %27, %28 : vector<8x1xf32>
    %30 = arith.mulf %25, %25 : vector<8x32xf32>
    %cst_15 = arith.constant dense<0.000000e+00> : vector<8xf32>
    %31 = vector.multi_reduction <add>, %30, %cst_15 [1] : vector<8x32xf32> to vector<8xf32>
    %32 = vector.shape_cast %31 : vector<8xf32> to vector<8x1xf32>
    %cst_16 = arith.constant 3.200000e+01 : f32
    %33 = vector.broadcast %cst_16 : f32 to vector<8x1xf32>
    %34 = arith.divf %32, %33 : vector<8x1xf32>
    %35 = arith.mulf %29, %29 : vector<8x1xf32>
    %36 = arith.subf %34, %35 : vector<8x1xf32>
    %cst_17 = arith.constant 0.000000e+00 : f32
    %37 = vector.broadcast %cst_17 : f32 to vector<8x1xf32>
    %38 = arith.maximumf %36, %37 : vector<8x1xf32>
    %39 = vector.broadcast %29 : vector<8x1xf32> to vector<8x32xf32>
    %40 = arith.subf %25, %39 : vector<8x32xf32>
    %cst_18 = arith.constant 9.99999974E-6 : f32
    %41 = vector.broadcast %cst_18 : f32 to vector<8x1xf32>
    %42 = arith.addf %38, %41 : vector<8x1xf32>
    %43 = math.rsqrt %42 : vector<8x1xf32>
    %44 = vector.broadcast %43 : vector<8x1xf32> to vector<8x32xf32>
    %45 = arith.mulf %40, %44 : vector<8x32xf32>
    %c0_19 = arith.constant 0 : index
    %c0_20 = arith.constant 0 : index
    %46 = vector.load %arg7[%c0_19, %c0_20] : memref<1x32xf32, #tpu.memory_space<vmem>>, vector<1x32xf32>
    %47 = vector.broadcast %46 : vector<1x32xf32> to vector<8x32xf32>
    %48 = arith.mulf %45, %47 : vector<8x32xf32>
    %c0_21 = arith.constant 0 : index
    %c0_22 = arith.constant 0 : index
    %49 = vector.load %arg8[%c0_21, %c0_22] : memref<1x32xf32, #tpu.memory_space<vmem>>, vector<1x32xf32>
    %50 = vector.broadcast %49 : vector<1x32xf32> to vector<8x32xf32>
    %51 = arith.addf %48, %50 : vector<8x32xf32>
    %cst_23 = arith.constant 0.000000e+00 : f32
    %52 = vector.broadcast %cst_23 : f32 to vector<8x32xf32>
    %53 = arith.maximumf %51, %52 : vector<8x32xf32>
    %c0_24 = arith.constant 0 : index
    %c0_25 = arith.constant 0 : index
    %54 = vector.load %arg9[%c0_24, %c0_25] : memref<32x32xf32, #tpu.memory_space<vmem>>, vector<32x32xf32>
    %cst_26 = arith.constant dense<0.000000e+00> : vector<8x32xf32>
    %55 = tpu.matmul %53, %54, %cst_26 {dimension_numbers = #tpu.dot_dimension_numbers<[1], [0], [0], [1], [0, 0, 1, 1], [], []>} : vector<8x32xf32>, vector<32x32xf32>, vector<8x32xf32> -> vector<8x32xf32>
    %c0_27 = arith.constant 0 : index
    %c0_28 = arith.constant 0 : index
    %56 = vector.load %arg10[%c0_27, %c0_28] : memref<1x32xf32, #tpu.memory_space<vmem>>, vector<1x32xf32>
    %57 = vector.broadcast %56 : vector<1x32xf32> to vector<8x32xf32>
    %58 = arith.addf %55, %57 : vector<8x32xf32>
    %cst_29 = arith.constant dense<0.000000e+00> : vector<8xf32>
    %59 = vector.multi_reduction <add>, %58, %cst_29 [1] : vector<8x32xf32> to vector<8xf32>
    %60 = vector.shape_cast %59 : vector<8xf32> to vector<8x1xf32>
    %cst_30 = arith.constant 3.200000e+01 : f32
    %61 = vector.broadcast %cst_30 : f32 to vector<8x1xf32>
    %62 = arith.divf %60, %61 : vector<8x1xf32>
    %63 = arith.mulf %58, %58 : vector<8x32xf32>
    %cst_31 = arith.constant dense<0.000000e+00> : vector<8xf32>
    %64 = vector.multi_reduction <add>, %63, %cst_31 [1] : vector<8x32xf32> to vector<8xf32>
    %65 = vector.shape_cast %64 : vector<8xf32> to vector<8x1xf32>
    %cst_32 = arith.constant 3.200000e+01 : f32
    %66 = vector.broadcast %cst_32 : f32 to vector<8x1xf32>
    %67 = arith.divf %65, %66 : vector<8x1xf32>
    %68 = arith.mulf %62, %62 : vector<8x1xf32>
    %69 = arith.subf %67, %68 : vector<8x1xf32>
    %cst_33 = arith.constant 0.000000e+00 : f32
    %70 = vector.broadcast %cst_33 : f32 to vector<8x1xf32>
    %71 = arith.maximumf %69, %70 : vector<8x1xf32>
    %72 = vector.broadcast %62 : vector<8x1xf32> to vector<8x32xf32>
    %73 = arith.subf %58, %72 : vector<8x32xf32>
    %cst_34 = arith.constant 9.99999974E-6 : f32
    %74 = vector.broadcast %cst_34 : f32 to vector<8x1xf32>
    %75 = arith.addf %71, %74 : vector<8x1xf32>
    %76 = math.rsqrt %75 : vector<8x1xf32>
    %77 = vector.broadcast %76 : vector<8x1xf32> to vector<8x32xf32>
    %78 = arith.mulf %73, %77 : vector<8x32xf32>
    %c0_35 = arith.constant 0 : index
    %c0_36 = arith.constant 0 : index
    %79 = vector.load %arg11[%c0_35, %c0_36] : memref<1x32xf32, #tpu.memory_space<vmem>>, vector<1x32xf32>
    %80 = vector.broadcast %79 : vector<1x32xf32> to vector<8x32xf32>
    %81 = arith.mulf %78, %80 : vector<8x32xf32>
    %c0_37 = arith.constant 0 : index
    %c0_38 = arith.constant 0 : index
    %82 = vector.load %arg12[%c0_37, %c0_38] : memref<1x32xf32, #tpu.memory_space<vmem>>, vector<1x32xf32>
    %83 = vector.broadcast %82 : vector<1x32xf32> to vector<8x32xf32>
    %84 = arith.addf %81, %83 : vector<8x32xf32>
    %85 = arith.addf %4, %84 : vector<8x32xf32>
    %c0_39 = arith.constant 0 : index
    %c0_40 = arith.constant 0 : index
    %86 = vector.load %arg13[%c0_39, %c0_40] : memref<32x32xf32, #tpu.memory_space<vmem>>, vector<32x32xf32>
    %cst_41 = arith.constant dense<0.000000e+00> : vector<8x32xf32>
    %87 = tpu.matmul %85, %86, %cst_41 {dimension_numbers = #tpu.dot_dimension_numbers<[1], [0], [0], [1], [0, 0, 1, 1], [], []>} : vector<8x32xf32>, vector<32x32xf32>, vector<8x32xf32> -> vector<8x32xf32>
    %c0_42 = arith.constant 0 : index
    %c0_43 = arith.constant 0 : index
    %88 = vector.load %arg14[%c0_42, %c0_43] : memref<16x32xf32, #tpu.memory_space<vmem>>, vector<16x32xf32>
    %cst_44 = arith.constant dense<0.000000e+00> : vector<8x32xf32>
    %89 = tpu.matmul %3, %88, %cst_44 {dimension_numbers = #tpu.dot_dimension_numbers<[1], [0], [0], [1], [0, 0, 1, 1], [], []>} : vector<8x16xf32>, vector<16x32xf32>, vector<8x32xf32> -> vector<8x32xf32>
    %90 = arith.addf %87, %89 : vector<8x32xf32>
    %c0_45 = arith.constant 0 : index
    %c0_46 = arith.constant 0 : index
    %91 = vector.load %arg15[%c0_45, %c0_46] : memref<1x32xf32, #tpu.memory_space<vmem>>, vector<1x32xf32>
    %92 = vector.broadcast %91 : vector<1x32xf32> to vector<8x32xf32>
    %93 = arith.addf %90, %92 : vector<8x32xf32>
    %cst_47 = arith.constant dense<0.000000e+00> : vector<8xf32>
    %94 = vector.multi_reduction <add>, %93, %cst_47 [1] : vector<8x32xf32> to vector<8xf32>
    %95 = vector.shape_cast %94 : vector<8xf32> to vector<8x1xf32>
    %cst_48 = arith.constant 3.200000e+01 : f32
    %96 = vector.broadcast %cst_48 : f32 to vector<8x1xf32>
    %97 = arith.divf %95, %96 : vector<8x1xf32>
    %98 = arith.mulf %93, %93 : vector<8x32xf32>
    %cst_49 = arith.constant dense<0.000000e+00> : vector<8xf32>
    %99 = vector.multi_reduction <add>, %98, %cst_49 [1] : vector<8x32xf32> to vector<8xf32>
    %100 = vector.shape_cast %99 : vector<8xf32> to vector<8x1xf32>
    %cst_50 = arith.constant 3.200000e+01 : f32
    %101 = vector.broadcast %cst_50 : f32 to vector<8x1xf32>
    %102 = arith.divf %100, %101 : vector<8x1xf32>
    %103 = arith.mulf %97, %97 : vector<8x1xf32>
    %104 = arith.subf %102, %103 : vector<8x1xf32>
    %cst_51 = arith.constant 0.000000e+00 : f32
    %105 = vector.broadcast %cst_51 : f32 to vector<8x1xf32>
    %106 = arith.maximumf %104, %105 : vector<8x1xf32>
    %107 = vector.broadcast %97 : vector<8x1xf32> to vector<8x32xf32>
    %108 = arith.subf %93, %107 : vector<8x32xf32>
    %cst_52 = arith.constant 9.99999974E-6 : f32
    %109 = vector.broadcast %cst_52 : f32 to vector<8x1xf32>
    %110 = arith.addf %106, %109 : vector<8x1xf32>
    %111 = math.rsqrt %110 : vector<8x1xf32>
    %112 = vector.broadcast %111 : vector<8x1xf32> to vector<8x32xf32>
    %113 = arith.mulf %108, %112 : vector<8x32xf32>
    %c0_53 = arith.constant 0 : index
    %c0_54 = arith.constant 0 : index
    %114 = vector.load %arg16[%c0_53, %c0_54] : memref<1x32xf32, #tpu.memory_space<vmem>>, vector<1x32xf32>
    %115 = vector.broadcast %114 : vector<1x32xf32> to vector<8x32xf32>
    %116 = arith.mulf %113, %115 : vector<8x32xf32>
    %c0_55 = arith.constant 0 : index
    %c0_56 = arith.constant 0 : index
    %117 = vector.load %arg17[%c0_55, %c0_56] : memref<1x32xf32, #tpu.memory_space<vmem>>, vector<1x32xf32>
    %118 = vector.broadcast %117 : vector<1x32xf32> to vector<8x32xf32>
    %119 = arith.addf %116, %118 : vector<8x32xf32>
    %cst_57 = arith.constant 0.000000e+00 : f32
    %120 = vector.broadcast %cst_57 : f32 to vector<8x32xf32>
    %121 = arith.maximumf %119, %120 : vector<8x32xf32>
    %c0_58 = arith.constant 0 : index
    %c0_59 = arith.constant 0 : index
    %122 = vector.load %arg18[%c0_58, %c0_59] : memref<32x32xf32, #tpu.memory_space<vmem>>, vector<32x32xf32>
    %cst_60 = arith.constant dense<0.000000e+00> : vector<8x32xf32>
    %123 = tpu.matmul %121, %122, %cst_60 {dimension_numbers = #tpu.dot_dimension_numbers<[1], [0], [0], [1], [0, 0, 1, 1], [], []>} : vector<8x32xf32>, vector<32x32xf32>, vector<8x32xf32> -> vector<8x32xf32>
    %c0_61 = arith.constant 0 : index
    %c0_62 = arith.constant 0 : index
    %124 = vector.load %arg19[%c0_61, %c0_62] : memref<1x32xf32, #tpu.memory_space<vmem>>, vector<1x32xf32>
    %125 = vector.broadcast %124 : vector<1x32xf32> to vector<8x32xf32>
    %126 = arith.addf %123, %125 : vector<8x32xf32>
    %cst_63 = arith.constant dense<0.000000e+00> : vector<8xf32>
    %127 = vector.multi_reduction <add>, %126, %cst_63 [1] : vector<8x32xf32> to vector<8xf32>
    %128 = vector.shape_cast %127 : vector<8xf32> to vector<8x1xf32>
    %cst_64 = arith.constant 3.200000e+01 : f32
    %129 = vector.broadcast %cst_64 : f32 to vector<8x1xf32>
    %130 = arith.divf %128, %129 : vector<8x1xf32>
    %131 = arith.mulf %126, %126 : vector<8x32xf32>
    %cst_65 = arith.constant dense<0.000000e+00> : vector<8xf32>
    %132 = vector.multi_reduction <add>, %131, %cst_65 [1] : vector<8x32xf32> to vector<8xf32>
    %133 = vector.shape_cast %132 : vector<8xf32> to vector<8x1xf32>
    %cst_66 = arith.constant 3.200000e+01 : f32
    %134 = vector.broadcast %cst_66 : f32 to vector<8x1xf32>
    %135 = arith.divf %133, %134 : vector<8x1xf32>
    %136 = arith.mulf %130, %130 : vector<8x1xf32>
    %137 = arith.subf %135, %136 : vector<8x1xf32>
    %cst_67 = arith.constant 0.000000e+00 : f32
    %138 = vector.broadcast %cst_67 : f32 to vector<8x1xf32>
    %139 = arith.maximumf %137, %138 : vector<8x1xf32>
    %140 = vector.broadcast %130 : vector<8x1xf32> to vector<8x32xf32>
    %141 = arith.subf %126, %140 : vector<8x32xf32>
    %cst_68 = arith.constant 9.99999974E-6 : f32
    %142 = vector.broadcast %cst_68 : f32 to vector<8x1xf32>
    %143 = arith.addf %139, %142 : vector<8x1xf32>
    %144 = math.rsqrt %143 : vector<8x1xf32>
    %145 = vector.broadcast %144 : vector<8x1xf32> to vector<8x32xf32>
    %146 = arith.mulf %141, %145 : vector<8x32xf32>
    %c0_69 = arith.constant 0 : index
    %c0_70 = arith.constant 0 : index
    %147 = vector.load %arg20[%c0_69, %c0_70] : memref<1x32xf32, #tpu.memory_space<vmem>>, vector<1x32xf32>
    %148 = vector.broadcast %147 : vector<1x32xf32> to vector<8x32xf32>
    %149 = arith.mulf %146, %148 : vector<8x32xf32>
    %c0_71 = arith.constant 0 : index
    %c0_72 = arith.constant 0 : index
    %150 = vector.load %arg21[%c0_71, %c0_72] : memref<1x32xf32, #tpu.memory_space<vmem>>, vector<1x32xf32>
    %151 = vector.broadcast %150 : vector<1x32xf32> to vector<8x32xf32>
    %152 = arith.addf %149, %151 : vector<8x32xf32>
    %153 = arith.addf %85, %152 : vector<8x32xf32>
    %c0_73 = arith.constant 0 : index
    %c0_74 = arith.constant 0 : index
    %154 = vector.load %arg22[%c0_73, %c0_74] : memref<8x32xf32, #tpu.memory_space<vmem>>, vector<8x32xf32>
    tpu.vector_store %arg22[%c0_73, %c0_74], %153 {strides = array<i32>} : memref<8x32xf32, #tpu.memory_space<vmem>>, vector<8x32xf32>,
    return
  }
  func.func @transform_0(%arg0: i32) -> (i32, i32) {
    %c0_i32 = arith.constant 0 : i32
    %c0_i32_0 = arith.constant 0 : i32
    return %arg0, %c0_i32 : i32, i32
  }
  func.func @transform_1(%arg0: i32) -> (i32, i32) {
    %c0_i32 = arith.constant 0 : i32
    %c0_i32_0 = arith.constant 0 : i32
    %c0_i32_1 = arith.constant 0 : i32
    return %c0_i32, %c0_i32_0 : i32, i32
  }
  func.func @transform_2(%arg0: i32) -> (i32, i32) {
    %c0_i32 = arith.constant 0 : i32
    %c0_i32_0 = arith.constant 0 : i32
    %c0_i32_1 = arith.constant 0 : i32
    return %c0_i32, %c0_i32_0 : i32, i32
  }
  func.func @transform_3(%arg0: i32) -> (i32, i32) {
    %c0_i32 = arith.constant 0 : i32
    %c0_i32_0 = arith.constant 0 : i32
    %c0_i32_1 = arith.constant 0 : i32
    return %c0_i32, %c0_i32_0 : i32, i32
  }
  func.func @transform_4(%arg0: i32) -> (i32, i32) {
    %c0_i32 = arith.constant 0 : i32
    %c0_i32_0 = arith.constant 0 : i32
    %c0_i32_1 = arith.constant 0 : i32
    return %c0_i32, %c0_i32_0 : i32, i32
  }
  func.func @transform_5(%arg0: i32) -> (i32, i32) {
    %c0_i32 = arith.constant 0 : i32
    %c0_i32_0 = arith.constant 0 : i32
    %c0_i32_1 = arith.constant 0 : i32
    return %c0_i32, %c0_i32_0 : i32, i32
  }
  func.func @transform_6(%arg0: i32) -> (i32, i32) {
    %c0_i32 = arith.constant 0 : i32
    %c0_i32_0 = arith.constant 0 : i32
    %c0_i32_1 = arith.constant 0 : i32
    return %c0_i32, %c0_i32_0 : i32, i32
  }
  func.func @transform_7(%arg0: i32) -> (i32, i32) {
    %c0_i32 = arith.constant 0 : i32
    %c0_i32_0 = arith.constant 0 : i32
    %c0_i32_1 = arith.constant 0 : i32
    return %c0_i32, %c0_i32_0 : i32, i32
  }
  func.func @transform_8(%arg0: i32) -> (i32, i32) {
    %c0_i32 = arith.constant 0 : i32
    %c0_i32_0 = arith.constant 0 : i32
    %c0_i32_1 = arith.constant 0 : i32
    return %c0_i32, %c0_i32_0 : i32, i32
  }
  func.func @transform_9(%arg0: i32) -> (i32, i32) {
    %c0_i32 = arith.constant 0 : i32
    %c0_i32_0 = arith.constant 0 : i32
    %c0_i32_1 = arith.constant 0 : i32
    return %c0_i32, %c0_i32_0 : i32, i32
  }
  func.func @transform_10(%arg0: i32) -> (i32, i32) {
    %c0_i32 = arith.constant 0 : i32
    %c0_i32_0 = arith.constant 0 : i32
    %c0_i32_1 = arith.constant 0 : i32
    return %c0_i32, %c0_i32_0 : i32, i32
  }
  func.func @transform_11(%arg0: i32) -> (i32, i32) {
    %c0_i32 = arith.constant 0 : i32
    %c0_i32_0 = arith.constant 0 : i32
    %c0_i32_1 = arith.constant 0 : i32
    return %c0_i32, %c0_i32_0 : i32, i32
  }
  func.func @transform_12(%arg0: i32) -> (i32, i32) {
    %c0_i32 = arith.constant 0 : i32
    %c0_i32_0 = arith.constant 0 : i32
    %c0_i32_1 = arith.constant 0 : i32
    return %c0_i32, %c0_i32_0 : i32, i32
  }
  func.func @transform_13(%arg0: i32) -> (i32, i32) {
    %c0_i32 = arith.constant 0 : i32
    %c0_i32_0 = arith.constant 0 : i32
    %c0_i32_1 = arith.constant 0 : i32
    return %c0_i32, %c0_i32_0 : i32, i32
  }
  func.func @transform_14(%arg0: i32) -> (i32, i32) {
    %c0_i32 = arith.constant 0 : i32
    %c0_i32_0 = arith.constant 0 : i32
    %c0_i32_1 = arith.constant 0 : i32
    return %c0_i32, %c0_i32_0 : i32, i32
  }
  func.func @transform_15(%arg0: i32) -> (i32, i32) {
    %c0_i32 = arith.constant 0 : i32
    %c0_i32_0 = arith.constant 0 : i32
    %c0_i32_1 = arith.constant 0 : i32
    return %c0_i32, %c0_i32_0 : i32, i32
  }
  func.func @transform_16(%arg0: i32) -> (i32, i32) {
    %c0_i32 = arith.constant 0 : i32
    %c0_i32_0 = arith.constant 0 : i32
    %c0_i32_1 = arith.constant 0 : i32
    return %c0_i32, %c0_i32_0 : i32, i32
  }
  func.func @transform_17(%arg0: i32) -> (i32, i32) {
    %c0_i32 = arith.constant 0 : i32
    %c0_i32_0 = arith.constant 0 : i32
    %c0_i32_1 = arith.constant 0 : i32
    return %c0_i32, %c0_i32_0 : i32, i32
  }
  func.func @transform_18(%arg0: i32) -> (i32, i32) {
    %c0_i32 = arith.constant 0 : i32
    %c0_i32_0 = arith.constant 0 : i32
    %c0_i32_1 = arith.constant 0 : i32
    return %c0_i32, %c0_i32_0 : i32, i32
  }
  func.func @transform_19(%arg0: i32) -> (i32, i32) {
    %c0_i32 = arith.constant 0 : i32
    %c0_i32_0 = arith.constant 0 : i32
    %c0_i32_1 = arith.constant 0 : i32
    return %c0_i32, %c0_i32_0 : i32, i32
  }
  func.func @transform_20(%arg0: i32) -> (i32, i32) {
    %c0_i32 = arith.constant 0 : i32
    %c0_i32_0 = arith.constant 0 : i32
    %c0_i32_1 = arith.constant 0 : i32
    return %c0_i32, %c0_i32_0 : i32, i32
  }
  func.func @transform_21(%arg0: i32) -> (i32, i32) {
    %c0_i32 = arith.constant 0 : i32
    %c0_i32_0 = arith.constant 0 : i32
    return %arg0, %c0_i32 : i32, i32
  }
}

</mosaic_0001>

<bundles_post_ra>
// kernel: context_model_forward.1
= control target key start
LH: loop header
LB: loop body
LE: loop exit
PB: predicated region body
PF: predicated region fallthrough
CT: control target
= control target key end

     0   :  { %s2277_s0 = inlined_call_operand.vmem [shape: f32[16,50], index: 0, kind: input, shape index: {}]   ;;  %s2278_s1 = inlined_call_operand.vmem [shape: f32[2,96], index: 1, kind: input, shape index: {}]   ;;  %s2279_s2 = inlined_call_operand.vmem [shape: f32[1,96], index: 2, kind: input, shape index: {}]   ;;  %s2280_s3 = inlined_call_operand.vmem [shape: f32[32,32], index: 3, kind: input, shape index: {}]   ;;  %s2281_s4 = inlined_call_operand.vmem [shape: f32[96,32], index: 4, kind: input, shape index: {}]   ;;  %s2282_s5 = inlined_call_operand.vmem [shape: f32[1,32], index: 5, kind: input, shape index: {}]   ;;  %s2283_s6 = inlined_call_operand.vmem [shape: f32[1,32], index: 6, kind: input, shape index: {}]   ;;  %s2284_s7 = inlined_call_operand.vmem [shape: f32[1,32], index: 7, kind: input, shape index: {}]   ;;  %s2285_s8 = inlined_call_operand.vmem [shape: f32[32,32], index: 8, kind: input, shape index: {}]   ;;  %s2286_s9 = inlined_call_operand.vmem [shape: f32[1,32], index: 9, kind: input, shape index: {}]   ;;  %s2287_s10 = inlined_call_operand.vmem [shape: f32[1,32], index: 10, kind: input, shape index: {}]   ;;  %s2288_s11 = inlined_call_operand.vmem [shape: f32[1,32], index: 11, kind: input, shape index: {}]   ;;  %s2289_s12 = inlined_call_operand.vmem [shape: f32[32,32], index: 12, kind: input, shape index: {}]   ;;  %s2290_s13 = inlined_call_operand.vmem [shape: f32[16,32], index: 13, kind: input, shape index: {}]   ;;  %s2291_s14 = inlined_call_operand.vmem [shape: f32[1,32], index: 14, kind: input, shape index: {}]   ;;  %s2292_s15 = inlined_call_operand.vmem [shape: f32[1,32], index: 15, kind: input, shape index: {}]   ;;  %s2293_s16 = inlined_call_operand.vmem [shape: f32[1,32], index: 16, kind: input, shape index: {}]   ;;  %s2294_s17 = inlined_call_operand.vmem [shape: f32[32,32], index: 17, kind: input, shape index: {}]   ;;  %s2295_s18 = inlined_call_operand.vmem [shape: f32[1,32], index: 18, kind: input, shape index: {}]   ;;  %s2296_s19 = inlined_call_operand.vmem [shape: f32[1,32], index: 19, kind: input, shape index: {}]   ;;  %s2297_s20 = inlined_call_operand.vmem [shape: f32[1,32], index: 20, kind: input, shape index: {}]   ;;  %s2298_s21 = inlined_call_operand.hbm [shape: f32[16,32], index: 21, kind: output, shape index: {}]  }
   0x1   :  { %2312 = sst [smem:[#allocation11_spill]] %s2277_s0 }
   0x2   :  { %2313 = sst [smem:[#allocation12_spill]] %s2278_s1 }
   0x3   :  { %2314 = sst [smem:[#allocation13_spill]] %s2279_s2 }
   0x4   :  { %2315 = sst [smem:[#allocation14_spill]] %s2280_s3 }
   0x5   :  { %2316 = sst [smem:[#allocation15_spill]] %s2281_s4 }
   0x6   :  { %2317 = sst [smem:[#allocation16_spill]] %s2282_s5 }
   0x7   :  { %2318 = sst [smem:[#allocation17_spill]] %s2283_s6 }
   0x8   :  { %26 = vsyncpa [#allocation3], 0 }
   0x9   :  { %28 = vsyncpa [#allocation3 + $0x1], 0  ;;  %s1965_s2 = smov 0   ;;  %s1967_s25 = smov 0  }
   0xa   :  { %s1969_s26 = smov 0   ;;  %s1971_s27 = smov 0  }
   0xb LB: > { %2319 = sst [smem:[#allocation5_spill]] %s1826_s2  ;;  %s1986_s3 = sadd.s32 4294967295, %s1838_s27   ;;  %s1838_s27 = sphi %s1971_s27, %s2340_s27   ;;  %s1834_s26 = sphi %s1969_s26, %s2342_s26   ;;  %s1830_s25 = sphi %s1967_s25, %s2344_s25   ;;  %s1826_s2 = sphi %s1965_s2, %s2343_s2  }
   0xc   : > { %2320 = sst [smem:[#allocation6_spill]] %s1834_s26  ;;  %s1511_s28 = sadd.s32 4294967294, %s1838_s27  }
   0xd   : > { %2321 = sst [smem:[#allocation7_spill]] %s1838_s27  ;;  %s1990_s29 = sadd.s32 1, %s1838_s27  }
   0xe   : > { %2322 = sst [smem:[#allocation8_spill]] %s1990_s29  ;;  %s487_s0 = sadd.s32 1, %s1834_s26 }
   0xf   : > { %s484_s4 = ssub.s32 %s1838_s27, %s1990_s29  ;;  %p497_p0 = scmp.ne.s32.totalorder %s1834_s26, %s1830_s25 }
  0x10   : > { %p485_p1 = scmp.eq.s32.totalorder %s484_s4, 0  ;;  %p498_p2 = scmp.eq.s32.totalorder %s1986_s3, 1 }
  0x11   : > { %p503_p3 = scmp.ne.s32.totalorder %s1830_s25, %s1826_s2  ;;  %p504_p4 = scmp.eq.s32.totalorder %s1511_s28, 1 }
  0x12   : > { %s2001_s30 = scalar_select %p485_p1, %s1834_s26, %s487_s0  }
  0x13   : > { %p2003_p5 = por %p498_p2, %p497_p0  ;;  %p2007_p6 = por %p504_p4, %p503_p3 }
  0x14   : > { %2323 = sst [smem:[#allocation9_spill]] %s2001_s30  ;;  %p1514_p7 = scmp.ge.s32.totalorder %s1838_s27, 1 }
  0x15   : > { %s2325_s22 = scalar_select %p2007_p6, 1, 0 }
  0x16   : > { %p589_p8 = scmp.lt.s32.totalorder %s1838_s27, 3 }
  0x17   : > { %2326 = sst [smem:[#allocation10_spill]] %s2325_s22 }
  0x18   : > { %p590_p9 = pnand %p1514_p7, %p589_p8 }
  0x19   : > { %p648_p10 = scmp.lt.s32.totalorder (!%p590_p9), %s1986_s3, 1  ;;  %v1840_v0 = vmov (!%p590_p9), 0   ;;  %s2327_s0 = sld [smem:[#allocation11_spill]] (!%p590_p9)  ;;  %v1842_v2 = vmov (!%p590_p9), 1   ;;  %v1843_v6 = vmov (!%p590_p9), 0.0|0.0   ;;  %vm1844_vm0 = vmmov (!%p590_p9), 0  }
  0x1a   : > { %593 = sbr.rel (%p590_p9) target bundleno = 2278 (0x8e6), region = 104  ;;  %1762 = vset.pattern.permute.xlu0 (!%p590_p9), %v1840_v0  ;;  %s2307_s30 = smov (!%p590_p9), 110   ;;  %1660 = vmatprep.subr.bf16.mxu0 (!%p590_p9), %v1843_v6  ;;  %v1845_v10 = vmov (!%p590_p9), 0.0   ;;  %vm879_vm1 = vcmask (!%p590_p9), 261120   ;;  %v1846_v50 = vmov (!%p590_p9), 2102212464  }
  0x1b   : > { %s2328_s22 = sld [smem:[#allocation15_spill]] (!%p590_p9)  ;;  %1678 = vmatprep.subr.bf16.mxu1 (!%p590_p9), %v1843_v6  ;;  %1617 = vmatprep.mubr.msk.f32.mxu1 (!%p590_p9), %vm1844_vm0, %v1845_v10  ;;  %s2330_s27 = sld [smem:[#allocation12_spill]] (!%p590_p9)  ;;  %v1847_v52 = vmov (!%p590_p9), 920167782   ;;  %v1848_v56 = vmov (!%p590_p9), 1326507024  }
  0x1c   : > { %1606 = vmatprep.mubr.msk.f32.mxu0 (!%p590_p9), %vm1844_vm0, %v1845_v10  ;;  %s2332_s2 = sld [smem:[#allocation13_spill]] (!%p590_p9)  ;;  %v1849_v58 = vmov (!%p590_p9), 683565275   ;;  %v1850_v60 = vmov (!%p590_p9), 2475754826   ;;  %vm803_vm14 = vcmask (!%p590_p9), 785408  }
  0x1d   : > { %v1851_v63 = vmov (!%p590_p9), 2131351028   ;;  %s2333_s24 = sld [smem:[#allocation16_spill]] (!%p590_p9)  ;;  %s2334_s6 = sld [smem:[#allocation17_spill]] (!%p590_p9) }
  0x1e   : > { %s2310_s29 = smov (!%p590_p9), 18   ;;  %s645_s28 = sand.u32 (!%p590_p9), 1, %s1830_s25  }
  0x1f   : > { %s1543_s26 = sshll.u32 (!%p590_p9), %s1986_s3, 7 }
  0x21   : > { %s649_s23 = scalar_select %p648_p10, %s1986_s3, 1  ;;  %v791_v3 = vld [vmem:[%s2328_s22] sm:$0xff]  ;;  %v792_v4 = vld [vmem:[%s2328_s22 + $0x8] sm:$0xff]  ;;  %v793_v5 = vld [vmem:[%s2328_s22 + $0x10] sm:$0xff] }
  0x22   : > { %v1661_v7 = vpack.c.bf16 %v792_v4, %v791_v3  ;;  %v794_v8 = vld [vmem:[%s2328_s22 + $0x18] sm:$0xff]  ;;  %v795_v12 = vld [vmem:[%s2328_s22 + $0x20] sm:$0xff]  ;;  %v796_v14 = vld [vmem:[%s2328_s22 + $0x28] sm:$0xff]  ;;  %s1854_s3 = smov [#allocation2]  }
  0x23   : > { %s1516_s1 = sshll.u32 %s649_s23, 3  ;;  %v1664_v11 = vpack.c.bf16 %v794_v8, %v793_v5  ;;  %v1667_v19 = vpack.c.bf16 %v796_v14, %v795_v12  ;;  %v797_v20 = vld [vmem:[%s2328_s22 + $0x30] sm:$0xff]  ;;  %v798_v21 = vld [vmem:[%s2328_s22 + $0x38] sm:$0xff]  ;;  %v799_v23 = vld [vmem:[%s2328_s22 + $0x40] sm:$0xff] }
  0x24   : > { %s651_s4 = scalar_lea.vmem %s2327_s0, %s1516_s1  ;;  %1662 = vmatpush3.bf16.msra.mxu0 %v1661_v7  ;;  %v1670_v22 = vpack.c.bf16 %v798_v21, %v797_v20  ;;  %v800_v24 = vld [vmem:[%s2328_s22 + $0x48] sm:$0xff]  ;;  %v801_v26 = vld [vmem:[%s2328_s22 + $0x50] sm:$0xff]  ;;  %v802_v27 = vld [vmem:[%s2328_s22 + $0x58] sm:$0xff]  ;;  %s1515_s0 = sshll.u32 %s645_s28, 3 }
  0x25   : > { %v2018_v1 = vld [vmem:[%s651_s4] sm:$0xff]  ;;  %s2329_s4 = sld [smem:[#allocation14_spill]]  ;;  %1663 = vmatprep.subr.bf16.mxu0 %v1843_v6  ;;  %v1673_v25 = vpack.c.bf16 %v800_v24, %v799_v23  ;;  %v1676_v28 = vpack.c.bf16 %v802_v27, %v801_v26  ;;  %s647_s23 = scalar_lea.vmem [#allocation2], %s1515_s0 }
  0x26   : > { %656 = vperm.xlu0 %1762, %v2018_v1   ;;  %877 = vrot.lane.b32.xlu1 %v2018_v1, %s2307_s30  ;;  %s2331_s30 = smov %s2330_s27  ;;  %v1517_v31 = vld [vmem:[%s2330_s27] ss:$0 sm:$0xff]  ;;  %s1452_s1 = sshll.u32 %s647_s23, 4  ;;  %s2236_s1 = int_to_ptr.vmem [resolvable:$true] %s1452_s1 }
  0x27   : > { %v1518_v32 = vld [vmem:[%s2331_s30 + $0x1] ss:$0 sm:$0xff]  ;;  %v1519_v36 = vld [vmem:[%s2332_s2] ss:$0 sm:$0xff]  ;;  %s1852_s2 = smov 126   ;;  %s1439_s27 = scalar_lea.sflag [#allocation3], %s645_s28 }
  0x28   : > { %1665 = vmatpush3.bf16.msra.mxu0 %v1664_v11 }
  0x29   : > { %1666 = vmatprep.subr.bf16.mxu0 %v1843_v6 }
  0x2a   : > { %1763 = vset.pattern.permute.xlu0 %v1842_v2 }
  0x2b   : > { %666 = vperm.xlu0 %1763, %v2018_v1   ;;  %v787_v9 = vld [vmem:[%s2329_s4] sm:$0xff]  ;;  %v788_v13 = vld [vmem:[%s2329_s4 + $0x8] sm:$0xff]  ;;  %v789_v16 = vld [vmem:[%s2329_s4 + $0x10] sm:$0xff] }
  0x2c   : > { %v1679_v15 = vpack.c.bf16 %v788_v13, %v787_v9  ;;  %v790_v17 = vld [vmem:[%s2329_s4 + $0x18] sm:$0xff]  ;;  %1668 = vmatpush3.bf16.msra.mxu0 %v1667_v19 }
  0x2d   : > { %v1682_v18 = vpack.c.bf16 %v790_v17, %v789_v16  ;;  %1669 = vmatprep.subr.bf16.mxu0 %v1843_v6 }
  0x2e   : > { %1680 = vmatpush3.bf16.msra.mxu1 %v1679_v15 }
  0x2f   : > { %1681 = vmatprep.subr.bf16.mxu1 %v1843_v6 }
  0x30   : > { %1671 = vmatpush3.bf16.msra.mxu0 %v1670_v22 }
  0x31   : > { %1672 = vmatprep.subr.bf16.mxu0 %v1843_v6 }
  0x32   : > { %1683 = vmatpush3.bf16.msra.mxu1 %v1682_v18 }
  0x33   : > { %1684 = vmatprep.subr.bf16.mxu1 %v1843_v6 }
  0x34   : > { %1674 = vmatpush3.bf16.msra.mxu0 %v1673_v25 }
  0x35   : > { %1675 = vmatprep.subr.bf16.mxu0 %v1843_v6 }
  0x38   : > { %1677 = vmatpush3.bf16.msra.mxu0 %v1676_v28 }
  0x39   : > { %1699 = vmatprep.subr.bf16.mxu0 %v1843_v6 }
  0x98   : > { %v878_v29 = vpop.permute.xlu1 %877 }
  0x99   : > { %1618 = vmatmul.mubr.msk.f32.vlgmr.msra.gmra.mrb[0].mxu1 %vm879_vm1, %v878_v29 }
  0x9a   : > { %1628 = vmatprep.mubr.msk.f32.mxu1 %vm1844_vm0, %v1845_v10 }
  0xa5   : > { %v657_v30 = vpop.permute.xlu0 %656 }
  0xa6   : > { %v663_v34 = vmul.f32 %v1517_v31, %v657_v30 }
  0xaa   : > { %v667_v33 = vpop.permute.xlu0 %666 }
  0xab   : > { %v673_v35 = vmul.f32 %v1518_v32, %v667_v33 }
  0xad   : > { %v674_v37 = vadd.f32 %v673_v35, %v663_v34 }
  0xaf   : > { %v2098_v38 = vadd.f32 %v1519_v36, %v674_v37 }
  0xb1   : > { %v686_v39 = vand.u32 2139095040, %v2098_v38  ;;  %v683_v40 = vand.u32 2147483647, %v2098_v38  ;;  %vm685_vm9 = vcmp.lt.s32.totalorder %v2098_v38, 0  ;;  %vm775_vm15 = vweird.f32 %v2098_v38 }
  0xb3   : > { %v687_v41 = vshrl.u32 %v686_v39, 23  ;;  %v690_v43 = vand.u32 8388607, %v683_v40  ;;  %vm684_vm10 = vcmp.le.f32.partialorder %v683_v40, 0.7853982 }
  0xb5   : > { %v1520_v42 = vadd.s32 4294967169, %v687_v41  ;;  %v691_v46 = vor.u32 8388608, %v690_v43 }
  0xb7   : > { %v693_v44 = vadd.s32 1, %v1520_v42  ;;  %v731_v54 = vshll.u32 %v691_v46, 8 }
  0xb9   : > { %vm694_vm2 = vcmp.gt.s32.totalorder %v693_v44, 0 }
  0xba   : > { %v695_v45 = vsel %vm694_vm2, %v693_v44, 0  ;;  %vm1123_vm2 = vcmask 130048  }
  0xbb   : > { %v697_v47 = vand.u32 31, %v695_v45  ;;  %v696_v48 = vshrl.u32 %v695_v45, 5 }
  0xbd   : > { %v698_v49 = vsub.s32 32, %v697_v47  ;;  %v709_v51 = vshll.u32 %v1846_v50, %v697_v47  ;;  %v712_v53 = vshll.u32 %v1847_v52, %v697_v47  ;;  %v700_v59 = vshll.u32 %v1849_v58, %v697_v47 }
  0xbe   : > { %v703_v62 = vshll.u32 %v1850_v60, %v697_v47  ;;  %v706_v2 = vshll.u32 %v1851_v63, %v697_v47  ;;  %vm718_vm3 = vcmp.lt.s32.totalorder %v696_v48, 4  ;;  %vm715_vm4 = vcmp.lt.s32.totalorder %v696_v48, 1 }
  0xbf   : > { %v710_v55 = vshrl.u32 %v1847_v52, %v698_v49  ;;  %v713_v57 = vshrl.u32 %v1848_v56, %v698_v49  ;;  %v701_v61 = vshrl.u32 %v1850_v60, %v698_v49  ;;  %v704_v0 = vshrl.u32 %v1851_v63, %v698_v49 }
  0xc0   : > { %v707_v3 = vshrl.u32 %v1846_v50, %v698_v49  ;;  %v699_v8 = vshrl.u32 %v1849_v58, %v698_v49  ;;  %vm716_vm5 = vcmp.lt.s32.totalorder %v696_v48, 2  ;;  %vm717_vm6 = vcmp.lt.s32.totalorder %v696_v48, 3 }
  0xc1   : > { %v711_v4 = vor.u32 %v710_v55, %v709_v51  ;;  %v714_v5 = vor.u32 %v713_v57, %v712_v53  ;;  %v702_v7 = vor.u32 %v701_v61, %v700_v59  ;;  %v705_v9 = vor.u32 %v704_v0, %v703_v62 }
  0xc2   : > { %v708_v11 = vor.u32 %v707_v3, %v706_v2 }
  0xc3   : > { %v724_v12 = vsel %vm718_vm3, %v711_v4, 920167782  ;;  %v728_v13 = vsel %vm718_vm3, %v714_v5, 1326507024  ;;  %v723_v15 = vsel %vm715_vm4, %v702_v7, %v705_v9  ;;  %v719_v18 = vsel %vm715_vm4, %v699_v8, %v702_v7 }
  0xc4   : > { %v720_v14 = vsel %vm718_vm3, %v708_v11, 2102212464  ;;  %v725_v16 = vsel %vm717_vm6, %v708_v11, %v724_v12  ;;  %v727_v17 = vsel %vm715_vm4, %v705_v9, %v708_v11  ;;  %v729_v21 = vsel %vm717_vm6, %v711_v4, %v728_v13  ;;  %v1526_v12 = vld [vmem:[%s2333_s24] ss:$0 sm:$0xff]  ;;  %s2234_s24 = scalar_lea.hbm %s2298_s21, %s1543_s26 }
  0xc5   : > { %v721_v19 = vsel %vm717_vm6, %v705_v9, %v720_v14  ;;  %v726_v20 = vsel %vm716_vm5, %v723_v15, %v725_v16  ;;  %v730_v22 = vsel %vm716_vm5, %v727_v17, %v729_v21 }
  0xc6   : > { %v2104_v23 = vmul.u32.u64.low %v731_v54, %v726_v20  ;;  %v2105_v24 = vmul.u32.u64.high %v731_v54, %v726_v20, %v2104_v23  ;;  %v2107_v25 = vmul.u32.u64.low %v731_v54, %v730_v22  ;;  %v2108_v26 = vmul.u32.u64.high %v731_v54, %v730_v22, %v2107_v25  ;;  %v996_v20 = vld [vmem:[%s2285_s8 + $0x10] sm:$0xff]  ;;  %v997_v22 = vld [vmem:[%s2285_s8 + $0x18] sm:$0xff] }
  0xc7   : > { %v722_v27 = vsel %vm716_vm5, %v719_v18, %v721_v19  ;;  %v994_v18 = vld [vmem:[%s2285_s8] sm:$0xff]  ;;  %v995_v19 = vld [vmem:[%s2285_s8 + $0x8] sm:$0xff] }
  0xc8   : > { %v741_v28 = vadd.s32 1, %v2105_v24  ;;  %v738_v29 = vmul.u32 %v731_v54, %v722_v27  ;;  %vm740_vm7 = vc.u32 %v2108_v26, %v2104_v23  ;;  %v739_v43 = vadd.s32 %v2104_v23, %v2108_v26 }
  0xc9   : > { %v1685_v21 = vpack.c.bf16 %v995_v19, %v994_v18  ;;  %v1688_v23 = vpack.c.bf16 %v997_v22, %v996_v20  ;;  %v1312_v22 = vld [vmem:[%s2294_s17] sm:$0xff] }
  0xca   : > { %v742_v30 = vsel %vm740_vm7, %v741_v28, %v2105_v24 }
  0xcb   : > { %v743_v31 = vadd.s32 %v742_v30, %v738_v29  ;;  %1686 = vmatpush3.bf16.msra.mxu1 %v1685_v21 }
  0xcc   : > { %1687 = vmatprep.subr.bf16.mxu1 %v1843_v6 }
  0xcd   : > { %v744_v32 = vadd.s32 536870912, %v743_v31 }
  0xcf   : > { %v745_v33 = vshrl.u32 %v744_v32, 30  ;;  %1689 = vmatpush3.bf16.msra.mxu1 %v1688_v23  ;;  %v1313_v23 = vld [vmem:[%s2294_s17 + $0x8] sm:$0xff] }
  0xd0   : > { %1690 = vmatprep.subr.bf16.mxu1 %v1843_v6 }
  0xd1   : > { %v746_v34 = vshll.u32 %v745_v33, 30  ;;  %v769_v55 = vsub.s32 4, %v745_v33 }
  0xd3   : > { %v747_v35 = vsub.s32 %v743_v31, %v746_v34  ;;  %v770_v58 = vsel %vm685_vm9, %v769_v55, %v745_v33  ;;  %v1527_v34 = vld [vmem:[%s2334_s6] ss:$0 sm:$0xff] }
  0xd4   : > { %v772_v60 = vsel %vm684_vm10, 0, %v770_v58  ;;  %v1120_v58 = vld [vmem:[%s2290_s13 + $0x8] sm:$0xff] }
  0xd5   : > { %v749_v36 = vsub.s32 0, %v747_v35  ;;  %v776_v61 = vadd.s32 3, %v772_v60 }
  0xd7   : > { %v1521_v37 = vmin.u32 %v749_v36, %v747_v35  ;;  %v777_v62 = vand.u32 3, %v776_v61  ;;  %v1528_v36 = vld [vmem:[%s2284_s7] ss:$0 sm:$0xff]  ;;  %v1116_v61 = vld [vmem:[%s2289_s12 + $0x8] sm:$0xff] }
  0xd9   : > { %v751_v39 = vclz %v1521_v37  ;;  %vm782_vm11 = vcmp.eq.s32.totalorder %v777_v62, 2  ;;  %vm779_vm12 = vcmp.eq.s32.totalorder %v777_v62, 0  ;;  %vm778_vm13 = vcmp.lt.s32.totalorder %v777_v62, 2 }
  0xdb   : > { %v1522_v41 = vadd.s32 4294967294, %v751_v39 }
  0xdd   : > { %vm1523_vm8 = vcmp.lt.s32.totalorder %v1522_v41, 0 }
  0xde   : > { %v754_v42 = vsel %vm1523_vm8, 0, %v1522_v41 }
  0xdf   : > { %v755_v44 = vsub.s32 32, %v754_v42  ;;  %v759_v45 = vsub.s32 4294967266, %v754_v42  ;;  %v756_v46 = vshll.u32 %v747_v35, %v754_v42  ;;  %v1529_v42 = vld [vmem:[%s2286_s9] ss:$0 sm:$0xff] }
  0xe1   : > { %v757_v47 = vshrl.u32 %v739_v43, %v755_v44  ;;  %v760_v48 = vadd.s32 127, %v759_v45 }
  0xe3   : > { %v758_v49 = vor.u32 %v757_v47, %v756_v46  ;;  %v761_v50 = vshll.u32 %v760_v48, 23 }
  0xe5   : > { %v762_v51 = vor.u32 4788187, %v761_v50  ;;  %v765_v53 = vcvt.s32.f32 %v758_v49 }
  0xe7   : > { %v763_v52 = vand.u32 2147483647, %v762_v51 }
  0xe9   : > { %v766_v54 = vmul.f32 %v765_v53, %v763_v52 }
  0xeb   : > { %v767_v56 = vxor.u32 2147483648, %v766_v54 }
  0xed   : > { %v768_v57 = vsel %vm685_vm9, %v767_v56, %v766_v54 }
  0xee   : > { %v771_v59 = vsel %vm684_vm10, %v2098_v38, %v768_v57  ;;  %v1119_v57 = vld [vmem:[%s2290_s13] sm:$0xff] }
  0xef   : > { %1764 = vcosq.f32 %v771_v59  ;;  %v1691_v60 = vpack.c.bf16 %v1120_v58, %v1119_v57 }
  0xf0   : > { %1766 = vsinq.f32 %v771_v59  ;;  %v1115_v59 = vld [vmem:[%s2289_s12] sm:$0xff] }
  0xf9   : > { %v1765_v63 = vpop.eup %1764 }
  0xfa   : > { %v1767_v0 = vpop.eup %1766  ;;  %v783_v2 = vxor.u32 2147483648, %v1765_v63 }
  0xfb   : > { %v780_v3 = vxor.u32 2147483648, %v1767_v0 }
  0xfc   : > { %v784_v4 = vsel %vm782_vm11, %v783_v2, %v1767_v0  ;;  %v1694_v0 = vpack.c.bf16 %v1116_v61, %v1115_v59 }
  0xfd   : > { %v781_v5 = vsel %vm779_vm12, %v1765_v63, %v780_v3  ;;  %v1531_v3 = vld [vmem:[%s2287_s10] ss:$0 sm:$0xff] }
  0xfe   : > { %v785_v40 = vsel %vm778_vm13, %v781_v5, %v784_v4  ;;  %v1117_v4 = vld [vmem:[%s2289_s12 + $0x10] sm:$0xff]  ;;  %v1118_v5 = vld [vmem:[%s2289_s12 + $0x18] sm:$0xff] }
  0xff   : > { %v786_v7 = vsel %vm775_vm15, nan, %v785_v40 }
 0x100   : > { %1607 = vmatmul.mubr.msk.f32.vlgmr.msra.gmra.mrb[0].mxu0 %vm803_vm14, %v786_v7  ;;  %v1532_v7 = vld [vmem:[%s2288_s11] ss:$0 sm:$0xff] }
 0x101   : > { %1657 = vmatprep.mubr.msk.f32.mxu0 %vm1844_vm0, %v1845_v10 }
 0x16c   : > { %v948_v8 = vpop.f32.mrb[0].mxu1 }
 0x16d   : > { %v1619_v9 = vpop.f32.mrb[1].mxu1 }
 0x16e   : > { %v1697_v9 = vpack.c.bf16 %v1118_v5, %v1117_v4 }
 0x1d3   : > { %v873_v11 = vpop.f32.mrb[0].mxu0 }
 0x1d4   : > { %v949_v13 = vadd.f32 %v948_v8, %v873_v11  ;;  %v1608_v14 = vpop.f32.mrb[1].mxu0 }
 0x1d6   : > { %v959_v15 = vadd.f32 %v1526_v12, %v949_v13 }
 0x1d8   : > { %v960_v16 = vsel %vm879_vm1, %v959_v15, 0.0  ;;  %v965_v17 = vmul.f32 %v959_v15, %v959_v15 }
 0x1d9   : > { %961 = vadd.xlane.f32.xlu1 %v960_v16 }
 0x1da   : > { %v966_v38 = vsel %vm879_vm1, %v965_v17, 0.0  ;;  %v1535_v17 = vld [vmem:[%s2291_s14] ss:$0 sm:$0xff] }
 0x1db   : > { %967 = vadd.xlane.f32.xlu0 %v966_v38 }
 0x266   : > { %v962_v24 = vpop.xlane.xlu1 %961 }
 0x267   : > { %v964_v25 = vmul.f32 0.03125, %v962_v24  ;;  %v1314_v24 = vld [vmem:[%s2294_s17 + $0x10] sm:$0xff] }
 0x268   : > { %v968_v26 = vpop.xlane.xlu0 %967 }
 0x269   : > { %v970_v27 = vmul.f32 %v964_v25, %v964_v25  ;;  %v969_v28 = vmul.f32 0.03125, %v968_v26  ;;  %v973_v32 = vsub.f32 %v959_v15, %v964_v25  ;;  %v1700_v25 = vpack.c.bf16 %v1313_v23, %v1312_v22  ;;  %v1315_v26 = vld [vmem:[%s2294_s17 + $0x18] sm:$0xff] }
 0x26b   : > { %v971_v29 = vsub.f32 %v969_v28, %v970_v27  ;;  %1701 = vmatpush3.bf16.msra.mxu0 %v1700_v25  ;;  %v1703_v27 = vpack.c.bf16 %v1315_v26, %v1314_v24 }
 0x26c   : > { %1702 = vmatprep.subr.bf16.mxu0 %v1843_v6 }
 0x26d   : > { %v972_v30 = vmax.f32 %v971_v29, 0.0 }
 0x26f   : > { %v974_v31 = vadd.f32 1e-05, %v972_v30  ;;  %1704 = vmatpush3.bf16.msra.mxu0 %v1703_v27 }
 0x271   : > { %1768 = vrsqrt.f32 %v974_v31 }
 0x27b   : > { %v1769_v33 = vpop.eup %1768 }
 0x27c   : > { %v976_v35 = vmul.f32 %v1769_v33, %v973_v32 }
 0x27e   : > { %v984_v37 = vmul.f32 %v1527_v34, %v976_v35 }
 0x280   : > { %v992_v39 = vadd.f32 %v1528_v36, %v984_v37 }
 0x282   : > { %v993_v41 = vmax.f32 %v992_v39, 0.0  ;;  %v1536_v39 = vld [vmem:[%s2292_s15] ss:$0 sm:$0xff] }
 0x284   : > { %1629 = vmatmul.mubr.msk.f32.vlgmr.msra.gmra.mrb[2].mxu1 %vm879_vm1, %v993_v41 }
 0x285   : > { %1635 = vmatprep.mubr.msk.f32.mxu1 %vm1844_vm0, %v1845_v10  ;;  %1692 = vmatpush3.bf16.msra.mxu1 %v1691_v60 }
 0x286   : > { %1693 = vmatprep.subr.bf16.mxu1 %v1843_v6 }
 0x357   : > { %v1074_v43 = vpop.f32.mrb[2].mxu1 }
 0x358   : > { %v1075_v44 = vadd.f32 %v1529_v42, %v1074_v43  ;;  %v1630_v45 = vpop.f32.mrb[3].mxu1 }
 0x359   : > { %v1538_v45 = vld [vmem:[%s2295_s18] ss:$0 sm:$0xff] }
 0x35a   : > { %v1078_v46 = vsel %vm879_vm1, %v1075_v44, 0.0  ;;  %v1082_v47 = vmul.f32 %v1075_v44, %v1075_v44 }
 0x35b   : > { %1079 = vadd.xlane.f32.xlu1 %v1078_v46 }
 0x35c   : > { %v1083_v48 = vsel %vm879_vm1, %v1082_v47, 0.0 }
 0x35d   : > { %1084 = vadd.xlane.f32.xlu0 %v1083_v48 }
 0x373   : > { %1121 = vrot.lane.b32.xlu0 %v2018_v1, %s1852_s2  ;;  %s2335_s2 = smov 110  }
 0x3e8   : > { %v1080_v49 = vpop.xlane.xlu1 %1079 }
 0x3e9   : > { %v1081_v50 = vmul.f32 0.03125, %v1080_v49 }
 0x3ea   : > { %v1085_v51 = vpop.xlane.xlu0 %1084 }
 0x3eb   : > { %v1087_v52 = vmul.f32 %v1081_v50, %v1081_v50  ;;  %v1086_v53 = vmul.f32 0.03125, %v1085_v51  ;;  %v1090_v62 = vsub.f32 %v1075_v44, %v1081_v50 }
 0x3ed   : > { %v1088_v54 = vsub.f32 %v1086_v53, %v1087_v52 }
 0x3ee   : > { %v1122_v63 = vpop.permute.xlu0 %1121 }
 0x3ef   : > { %v1089_v55 = vmax.f32 %v1088_v54, 0.0  ;;  %1636 = vmatmul.mubr.msk.f32.vlgmr.msra.gmra.mrb[4].mxu1 %vm1123_vm2, %v1122_v63 }
 0x3f0   : > { %1695 = vmatpush3.bf16.msra.mxu1 %v1694_v0  ;;  %1646 = vmatprep.mubr.msk.f32.mxu1 %vm1844_vm0, %v1845_v10  ;;  %v1541_v0 = vld [vmem:[%s2297_s20] ss:$0 sm:$0xff] }
 0x3f1   : > { %v1091_v56 = vadd.f32 1e-05, %v1089_v55  ;;  %1696 = vmatprep.subr.bf16.mxu1 %v1843_v6  ;;  %v1537_v6 = vld [vmem:[%s2293_s16] ss:$0 sm:$0xff] }
 0x3f3   : > { %1770 = vrsqrt.f32 %v1091_v56 }
 0x3f4   : > { %1698 = vmatpush3.bf16.msra.mxu1 %v1697_v9 }
 0x3fd   : > { %v1771_v2 = vpop.eup %1770 }
 0x3fe   : > { %v1093_v40 = vmul.f32 %v1771_v2, %v1090_v62  ;;  %v1540_v62 = vld [vmem:[%s2296_s19] ss:$0 sm:$0xff] }
 0x400   : > { %v1101_v8 = vmul.f32 %v1531_v3, %v1093_v40 }
 0x402   : > { %v1109_v11 = vadd.f32 %v1532_v7, %v1101_v8 }
 0x404   : > { %1111 = vrot.lane.b32.xlu1 %v1109_v11, %s2310_s29  ;;  %s2336_s29 = smov 18  }
 0x476   : > { %v1112_v12 = vpop.permute.xlu1 %1111 }
 0x477   : > { %v2185_v13 = vadd.f32 %v1112_v12, %v2018_v1 }
 0x479   : > { %1197 = vrot.lane.b32.xlu1 %v2185_v13, %s2335_s2 }
 0x4c2   : > { %v1192_v14 = vpop.f32.mrb[4].mxu1 }
 0x4c3   : > { %v1637_v15 = vpop.f32.mrb[5].mxu1 }
 0x4eb   : > { %v1198_v16 = vpop.permute.xlu1 %1197 }
 0x4ec   : > { %1647 = vmatmul.mubr.msk.f32.vlgmr.msra.gmra.mrb[6].mxu1 %vm879_vm1, %v1198_v16 }
 0x5bf   : > { %v1267_v10 = vpop.f32.mrb[6].mxu1 }
 0x5c0   : > { %v1268_v38 = vadd.f32 %v1267_v10, %v1192_v14  ;;  %v1648_v18 = vpop.f32.mrb[7].mxu1 }
 0x5c2   : > { %v1278_v19 = vadd.f32 %v1535_v17, %v1268_v38 }
 0x5c4   : > { %v1279_v20 = vsel %vm879_vm1, %v1278_v19, 0.0  ;;  %v1283_v1 = vmul.f32 %v1278_v19, %v1278_v19 }
 0x5c5   : > { %1280 = vadd.xlane.f32.xlu1 %v1279_v20 }
 0x5c6   : > { %v1284_v21 = vsel %vm879_vm1, %v1283_v1, 0.0 }
 0x5c7   : > { %1285 = vadd.xlane.f32.xlu0 %v1284_v21 }
 0x652   : > { %v1281_v28 = vpop.xlane.xlu1 %1280 }
 0x653   : > { %v1282_v29 = vmul.f32 0.03125, %v1281_v28 }
 0x654   : > { %v1286_v30 = vpop.xlane.xlu0 %1285 }
 0x655   : > { %v1288_v31 = vmul.f32 %v1282_v29, %v1282_v29  ;;  %v1287_v32 = vmul.f32 0.03125, %v1286_v30  ;;  %v1291_v36 = vsub.f32 %v1278_v19, %v1282_v29 }
 0x657   : > { %v1289_v33 = vsub.f32 %v1287_v32, %v1288_v31 }
 0x659   : > { %v1290_v34 = vmax.f32 %v1289_v33, 0.0 }
 0x65b   : > { %v1292_v35 = vadd.f32 1e-05, %v1290_v34 }
 0x65d   : > { %1772 = vrsqrt.f32 %v1292_v35 }
 0x667   : > { %v1773_v37 = vpop.eup %1772 }
 0x668   : > { %v1294_v41 = vmul.f32 %v1773_v37, %v1291_v36 }
 0x66a   : > { %v1302_v42 = vmul.f32 %v1536_v39, %v1294_v41 }
 0x66c   : > { %v1310_v43 = vadd.f32 %v1537_v6, %v1302_v42 }
 0x66e   : > { %v1311_v44 = vmax.f32 %v1310_v43, 0.0 }
 0x670   : > { %1658 = vmatmul.mubr.msk.f32.vlgmr.msra.gmra.mrb[2].mxu0 %vm879_vm1, %v1311_v44 }
 0x743   : > { %v1392_v46 = vpop.f32.mrb[2].mxu0 }
 0x744   : > { %v1393_v47 = vadd.f32 %v1538_v45, %v1392_v46  ;;  %v1659_v48 = vpop.f32.mrb[3].mxu0 }
 0x746   : > { %v1396_v49 = vsel %vm879_vm1, %v1393_v47, 0.0  ;;  %v1400_v50 = vmul.f32 %v1393_v47, %v1393_v47 }
 0x747   : > { %1397 = vadd.xlane.f32.xlu0 %v1396_v49 }
 0x748   : > { %v1401_v51 = vsel %vm879_vm1, %v1400_v50, 0.0 }
 0x749   : > { %1402 = vadd.xlane.f32.xlu1 %v1401_v51 }
 0x7d4   : > { %v1398_v52 = vpop.xlane.xlu0 %1397 }
 0x7d5   : > { %v1399_v53 = vmul.f32 0.03125, %v1398_v52 }
 0x7d6   : > { %v1403_v54 = vpop.xlane.xlu1 %1402 }
 0x7d7   : > { %v1405_v55 = vmul.f32 %v1399_v53, %v1399_v53  ;;  %v1404_v56 = vmul.f32 0.03125, %v1403_v54  ;;  %v1408_v60 = vsub.f32 %v1393_v47, %v1399_v53 }
 0x7d9   : > { %v1406_v57 = vsub.f32 %v1404_v56, %v1405_v55 }
 0x7db   : > { %v1407_v58 = vmax.f32 %v1406_v57, 0.0 }
 0x7dd   : > { %v1409_v59 = vadd.f32 1e-05, %v1407_v58 }
 0x7df   : > { %1774 = vrsqrt.f32 %v1409_v59 }
 0x7e9   : > { %v1775_v61 = vpop.eup %1774 }
 0x7ea   : > { %v1411_v63 = vmul.f32 %v1775_v61, %v1408_v60 }
 0x7ec   : > { %v1419_v2 = vmul.f32 %v1540_v62, %v1411_v63 }
 0x7ee   : > { %v1427_v3 = vadd.f32 %v1541_v0, %v1419_v2 }
 0x7f0   : > { %1429 = vrot.lane.b32.xlu0 %v1427_v3, %s2336_s29  ;;  %s1780_s29 = sshll.u32 %s1854_s3, 4  ;;  %s1781_s29 = int_to_ptr.vmem [resolvable:$false] %s1780_s29 }
 0x7f1   : > { %s1782_s6 = scalar_lea.vmem %s1781_s29, 256  ;;  %p1783_p0 = scmp.lt.s32.totalorder %s2236_s1, %s1781_s29 }
 0x862   : > { %v1430_v4 = vpop.permute.xlu0 %1429 }
 0x863   : > { %v1432_v5 = vadd.f32 %v1430_v4, %v2185_v13 }
 0x865   : > { %1434 = vrot.lane.b32.xlu1 %v1432_v5, %s2335_s2  ;;  %s1776_s2 = scalar_lea.vmem %s2236_s1, 128 }
 0x866   : > { %p1777_p11 = scmp.ne.s32.totalorder %s2236_s1, %s1776_s2  ;;  %p1784_p1 = scmp.lt.s32.totalorder %s1782_s6, %s1776_s2 }
 0x868   : > { %p1778_p12 = pnand %p1777_p11, %p2003_p5  ;;  %p1785_p2 = por %p1784_p1, %p1783_p0 }
 0x86a   : > { %p1779_p13 = pneg %p1778_p12 }
 0x86c   : > { %p1786_p3 = pnand %p1785_p2, %p1779_p13 }
 0x8d7   : > { %v1435_v40 = vpop.permute.xlu1 %1434 }
 0x8d8   : > { %1437 = vst.msk [vmem:[%s647_s23] sm:$0xff] %vm879_vm1, %v1435_v40 }
 0x8d9   : > { %1789 = shalt.err (!%p1786_p3)
}
 0x8da   : > { %s1790_s4 = scalar_lea.hbm %s2234_s24, 128  ;;  %s1794_s26 = scalar_lea.hbm %s2298_s21, 256 }
 0x8db   : > { %p1791_p4 = scmp.ne.s32.totalorder %s2234_s24, %s1790_s4  ;;  %p1795_p9 = scmp.lt.u32.totalorder %s2234_s24, %s2298_s21 }
 0x8dc   : > { %p1796_p10 = scmp.lt.u32.totalorder %s1794_s26, %s1790_s4  ;;  %p1798_p12 = scmp.lt.u32.totalorder %s1790_s4, %s2234_s24 }
 0x8dd   : > { %p1792_p7 = pnand %p1791_p4, %p2003_p5 }
 0x8de   : > { %p1797_p11 = por %p1796_p10, %p1795_p9 }
 0x8df   : > { %p1793_p8 = pneg %p1792_p7 }
 0x8e0   : > { %p1799_p13 = por %p1798_p12, %p1797_p11 }
 0x8e2   : > { %p1800_p0 = pnand %p1799_p13, %p1793_p8 }
 0x8e4   : > { %1803 = shalt.err (!%p1800_p0)
}
 0x8e5   : > { %1709 = dma.vmem_to_hbm [thread:$0]  (%p2003_p5), %s2236_s1, 128, %s2234_s24, %s1439_s27  }
 0x8e6 PF: > { %s2337_s2 = sld [smem:[#allocation7_spill]]  ;;  %s2338_s29 = sld [smem:[#allocation5_spill]] }
 0x8ec   : > { %p1715_p1 = scmp.ge.s32.totalorder %s2337_s2, 2  ;;  %s1464_s28 = sand.u32 1, %s2338_s29  }
 0x8ed   : > { %s1465_s0 = scalar_lea.sflag [#allocation3], %s1464_s28 }
 0x8ee   : > { %p1712_p2 = pnand %p1715_p1, %p2007_p6 }
 0x8f0   : > { %1821 = dma.done.wait (!%p1712_p2), %s1465_s0, 128  }
 0x8f1   : > { %1823 = vsyncadd (!%p1712_p2), %s1465_s0, 4294967168  ;;  %s2340_s27 = sld [smem:[#allocation8_spill]]  ;;  %s2341_s4 = sld [smem:[#allocation6_spill]] }
 0x8f2   : > { %s2342_s26 = sld [smem:[#allocation9_spill]]  ;;  %s2343_s2 = smov %s1830_s25 }
 0x8f7   : > { %p31_p3 = scmp.ge.s32.totalorder %s2340_s27, 4   ;;  %s2344_s25 = smov %s2341_s4 }
 0x8f9   :  { %33 = sbr.rel (!%p31_p3) target bundleno = 11 (0xb), region = 139 }
 0x900   :  { %1470 = vsyncpa [#allocation3], 1 }
 0x901   :  { %1472 = vsyncpa [#allocation3 + $0x1], 1 }

</bundles_post_ra>
